<compile_context>
chip_gen: v6e
topology: v6e:2x2x1
jax: 0.10.0
libtpu: 0.0.40
codegen_flags: <defaults>
</compile_context>

<pallas_src>
import functools

import jax
import jax.numpy as jnp
from jax.experimental import pallas as pl
from jax.experimental.pallas import tpu as pltpu

LOG_SIG_MAX = 2.0
LOG_SIG_MIN = -20.0
HIDDEN = 64
HEAD_PAD = 128                 # lane-dense fused (mean | log_std | zero) head width
TRUNK_ROWS = 3 * HIDDEN + 8    # w2|w3|w4 stacked + 8 bias rows (b1..b4 in rows 0..3)
HEAD_ROWS = HIDDEN + 8         # head weight + 8 tail rows (bias / lo / hi / zeros)
_BIG = 1e30                    # "no clamp" bound for mean / pad lanes (bf16-representable)


def _round_up(x, m):
    return (x + m - 1) // m * m


def init_actor_params(key, state_dim, action_dim, dtype=jnp.float32):
    """nn.Linear-style init (uniform +-1/sqrt(fan_in)); weights stored [in, out]."""
    dims = [(state_dim, HIDDEN), (HIDDEN, HIDDEN), (HIDDEN, HIDDEN), (HIDDEN, HIDDEN),
            (HIDDEN, action_dim), (HIDDEN, action_dim)]
    params = []
    for fan_in, fan_out in dims:
        key, kw, kb = jax.random.split(key, 3)
        bound = 1.0 / jnp.sqrt(jnp.asarray(fan_in, dtype))
        w = jax.random.uniform(kw, (fan_in, fan_out), dtype, -bound, bound)
        b = jax.random.uniform(kb, (1, fan_out), dtype, -bound, bound)
        params.append((w, b))
    return params


def pack_actor_params(params, state_dim, action_dim, dtype=jnp.bfloat16):
    """Pack the 6 (w, b) pairs into three bf16 slabs (done once, host side).

    Returns:
      w1: [state_dim, 64]   fc1 weight (no padding needed, full-dim block).
      wt: [3*64 + 8, 64]    fc2|fc3|fc4 weights + bias rows b1..b4.
      wh: [64 + 8, 128]     fused (mean|log_std) head weight; tail rows:
                            row 64 = bias, row 65 = clamp lo, row 66 = clamp hi.
    """
    assert 2 * action_dim <= HEAD_PAD, "action_dim too large for fused 128-wide head"
    (w1, b1), (w2, b2), (w3, b3), (w4, b4), (wm, bm), (ws, bs) = params
    f32 = jnp.float32
    ad = action_dim

    w1p = jnp.asarray(w1, f32).astype(dtype)

    bias_rows = jnp.zeros((8, HIDDEN), f32)
    bias_rows = bias_rows.at[0:1].set(b1).at[1:2].set(b2).at[2:3].set(b3).at[3:4].set(b4)
    wt = jnp.concatenate([jnp.asarray(w2, f32), jnp.asarray(w3, f32),
                          jnp.asarray(w4, f32), bias_rows], axis=0).astype(dtype)

    head_w = jnp.zeros((HIDDEN, HEAD_PAD), f32)
    head_w = head_w.at[:, :ad].set(wm).at[:, ad:2 * ad].set(ws)
    tail = jnp.zeros((8, HEAD_PAD), f32)
    tail = tail.at[0, :ad].set(bm[0]).at[0, ad:2 * ad].set(bs[0])
    lo = jnp.full((HEAD_PAD,), -_BIG, f32).at[ad:2 * ad].set(LOG_SIG_MIN)
    hi = jnp.full((HEAD_PAD,), _BIG, f32).at[ad:2 * ad].set(LOG_SIG_MAX)
    tail = tail.at[1].set(lo).at[2].set(hi)
    wh = jnp.concatenate([head_w, tail], axis=0).astype(dtype)
    return w1p, wt, wh


def _actor_kernel(x_ref, w1_ref, wt_ref, wh_ref, out_ref):
    f32 = jnp.float32
    bf16 = jnp.bfloat16

    btile = wt_ref[3 * HIDDEN:3 * HIDDEN + 8, :].astype(f32)   # [8, 64]; rows 0..3 = b1..b4
    htail = wh_ref[HIDDEN:HIDDEN + 8, :].astype(f32)           # row 0 bias, 1 lo, 2 hi

    # fc1 (K = state_dim): bf16 operands, f32 accumulation; bias/ReLU in f32.
    h = jnp.dot(x_ref[...].astype(bf16), w1_ref[...], preferred_element_type=f32)
    h = jnp.maximum(h + btile[0:1, :], 0.0)

    # fc2..fc4 (K = 64), weights sliced at static sublane-aligned offsets.
    for i in range(3):
        w = wt_ref[i * HIDDEN:(i + 1) * HIDDEN, :]
        h = jnp.dot(h.astype(bf16), w, preferred_element_type=f32)
        h = jnp.maximum(h + btile[i + 1:i + 2, :], 0.0)

    # Fused (mean | log_std) head; clamp via precomputed per-lane bound rows
    # (mean/pad lanes get +-1e30 bounds, i.e. a no-op).
    y = jnp.dot(h.astype(bf16), wh_ref[0:HIDDEN, :], preferred_element_type=f32)
    y = y + htail[0:1, :]
    y = jnp.minimum(jnp.maximum(y, htail[1:2, :]), htail[2:3, :])

    # Store only the useful columns: [rows, 2*action_dim] f32, full-dim last axis.
    out_ref[...] = y[:, :out_ref.shape[1]].astype(out_ref.dtype)


def _choose_blocking(n):
    """Rows per grid step and step count; even >=2 steps so both v7x TCs are used."""
    n8 = _round_up(max(n, 1), 8)
    max_block = 4096
    if n8 <= 256:
        return n8, 1                       # tiny batch: per-step overhead dominates
    steps = max(2, -(-n8 // max_block))
    if steps % 2:
        steps += 1                         # even step count -> balanced megacore split
    block_rows = _round_up(-(-n8 // steps), 8)
    return block_rows, steps


@functools.partial(jax.jit, static_argnames=("action_dim",))
def actor_forward(state, w1, wt, wh, *, action_dim):
    """state: [n, state_dim] f32 -> (mean [n, action_dim], log_std [n, action_dim])."""
    n, state_dim = state.shape
    out_w = 2 * action_dim
    block_rows, steps = _choose_blocking(n)
    n_pad = block_rows * steps

    x = state
    if n_pad != n:                          # only a small row tail gets zero-padded
        x = jnp.zeros((n_pad, state_dim), state.dtype).at[:n].set(state)

    weight_bytes = 2 * (state_dim * HIDDEN + TRUNK_ROWS * HIDDEN + HEAD_ROWS * HEAD_PAD)
    flops = 2 * n_pad * (state_dim * HIDDEN + 3 * HIDDEN * HIDDEN + HIDDEN * HEAD_PAD)
    bytes_accessed = 4 * n_pad * (state_dim + out_w) + weight_bytes

    # Scoped-VMEM headroom only when blocks get large (v5e default is 16 MiB).
    vmem_est = 2 * 4 * block_rows * (state_dim + out_w) + 2 * weight_bytes + (2 << 20)
    cp = dict(dimension_semantics=("parallel",))
    if vmem_est > 12 * 1024 * 1024:
        cp["vmem_limit_bytes"] = min(vmem_est + (8 << 20), 48 * 1024 * 1024)

    out = pl.pallas_call(
        _actor_kernel,
        out_shape=jax.ShapeDtypeStruct((n_pad, out_w), jnp.float32),
        grid=(steps,),
        in_specs=[
            pl.BlockSpec((block_rows, state_dim), lambda i: (i, 0)),
            pl.BlockSpec((state_dim, HIDDEN), lambda i: (0, 0)),    # weights stay VMEM-resident
            pl.BlockSpec((TRUNK_ROWS, HIDDEN), lambda i: (0, 0)),
            pl.BlockSpec((HEAD_ROWS, HEAD_PAD), lambda i: (0, 0)),
        ],
        out_specs=pl.BlockSpec((block_rows, out_w), lambda i: (i, 0)),
        compiler_params=pltpu.CompilerParams(**cp),
        cost_estimate=pl.CostEstimate(flops=flops, transcendentals=0,
                                      bytes_accessed=bytes_accessed),
    )(x, w1, wt, wh)

    mean = out[:n, :action_dim]
    log_std = out[:n, action_dim:out_w]
    return mean, log_std


# TODO(synk): Actor.sample() (Normal rsample + tanh + action_scale/bias) could be fused
# into the kernel tail via pltpu.prng_seed/prng_random_bits (free EUP/VPU slack); kept
# host-side here to preserve the module's forward() semantics.

if __name__ == "__main__":
    batch = 2
    state_dim = 16
    action_dim = 8

    key = jax.random.PRNGKey(0)
    key_params, key_state = jax.random.split(key)

    params = init_actor_params(key_params, state_dim, action_dim)
    state = jax.random.normal(key_state, (batch, state_dim), jnp.float32)

    w1, wt, wh = pack_actor_params(params, state_dim, action_dim)
    mean, log_std = actor_forward(state, w1, wt, wh, action_dim=action_dim)
    jax.block_until_ready((mean, log_std))

    # f32 reference (the PyTorch module's math).
    def ref_f32(x, ps):
        h = x
        for (w, b) in ps[:4]:
            h = jnp.maximum(h @ w + b, 0.0)
        m = h @ ps[4][0] + ps[4][1]
        ls = jnp.clip(h @ ps[5][0] + ps[5][1], LOG_SIG_MIN, LOG_SIG_MAX)
        return m, ls

    # bf16-matched reference (same casts / f32 accumulation the kernel performs).
    def ref_bf16(x, ps):
        bf, f32 = jnp.bfloat16, jnp.float32
        cast = lambda a: jnp.asarray(a, f32).astype(bf)
        h = x
        for (w, b) in ps[:4]:
            h = jnp.dot(h.astype(bf), cast(w), preferred_element_type=f32)
            h = jnp.maximum(h + cast(b).astype(f32), 0.0)
        m = jnp.dot(h.astype(bf), cast(ps[4][0]), preferred_element_type=f32) \
            + cast(ps[4][1]).astype(f32)
        ls = jnp.dot(h.astype(bf), cast(ps[5][0]), preferred_element_type=f32) \
            + cast(ps[5][1]).astype(f32)
        return m, jnp.clip(ls, LOG_SIG_MIN, LOG_SIG_MAX)

    m32, ls32 = ref_f32(state, params)
    mbf, lsbf = ref_bf16(state, params)

    assert mean.shape == (batch, action_dim)
    assert log_std.shape == (batch, action_dim)
    # Tight check vs matched-precision reference (catches packing/indexing bugs).
    assert jnp.allclose(mean, mbf, atol=2e-3, rtol=2e-3), "mean vs bf16-matched ref"
    assert jnp.allclose(log_std, lsbf, atol=2e-3, rtol=2e-3), "log_std vs bf16-matched ref"
    # Loose sanity check vs exact f32 reference (bf16 MXU feed is a precision trade-off).
    assert jnp.allclose(mean, m32, atol=5e-2, rtol=5e-2), "mean vs f32 ref"
    assert jnp.allclose(log_std, ls32, atol=5e-2, rtol=5e-2), "log_std vs f32 ref"

    print("KERNEL_OK")
</pallas_src>

<mosaic_0001>
module attributes {stable_mosaic.version = 11 : i64} {
  func.func @_actor_kernel(%arg0: i32, %arg1: memref<8x16xf32, #tpu.memory_space<vmem>>, %arg2: memref<16x64xbf16, #tpu.memory_space<vmem>>, %arg3: memref<200x64xbf16, #tpu.memory_space<vmem>>, %arg4: memref<72x128xbf16, #tpu.memory_space<vmem>>, %arg5: memref<8x16xf32, #tpu.memory_space<vmem>>) attributes {dimension_semantics = [#tpu.dimension_semantics<parallel>], iteration_bounds = array<i64: 1>, scalar_prefetch = 0 : i64, scratch_operands = 0 : i64, tpu.core_type = #tpu.core_type<tc>, window_params = [{transform_indices = @transform_0, window_bounds = array<i64: 8, 16>}, {pipeline_mode = #tpu.pipeline_mode<synchronous>, transform_indices = @transform_1, window_bounds = array<i64: 16, 64>}, {pipeline_mode = #tpu.pipeline_mode<synchronous>, transform_indices = @transform_2, window_bounds = array<i64: 200, 64>}, {pipeline_mode = #tpu.pipeline_mode<synchronous>, transform_indices = @transform_3, window_bounds = array<i64: 72, 128>}, {transform_indices = @transform_4, window_bounds = array<i64: 8, 16>}]} {
    %c192 = arith.constant 192 : index
    %c0 = arith.constant 0 : index
    %0 = vector.load %arg3[%c192, %c0] : memref<200x64xbf16, #tpu.memory_space<vmem>>, vector<8x64xbf16>
    %1 = arith.extf %0 : vector<8x64xbf16> to vector<8x64xf32>
    %c64 = arith.constant 64 : index
    %c0_0 = arith.constant 0 : index
    %2 = vector.load %arg4[%c64, %c0_0] : memref<72x128xbf16, #tpu.memory_space<vmem>>, vector<8x128xbf16>
    %3 = arith.extf %2 : vector<8x128xbf16> to vector<8x128xf32>
    %c0_1 = arith.constant 0 : index
    %c0_2 = arith.constant 0 : index
    %4 = vector.load %arg1[%c0_1, %c0_2] : memref<8x16xf32, #tpu.memory_space<vmem>>, vector<8x16xf32>
    %5 = arith.truncf %4 : vector<8x16xf32> to vector<8x16xbf16>
    %c0_3 = arith.constant 0 : index
    %c0_4 = arith.constant 0 : index
    %6 = vector.load %arg2[%c0_3, %c0_4] : memref<16x64xbf16, #tpu.memory_space<vmem>>, vector<16x64xbf16>
    %cst = arith.constant dense<0.000000e+00> : vector<8x64xf32>
    %7 = tpu.matmul %5, %6, %cst {dimension_numbers = #tpu.dot_dimension_numbers<[1], [0], [0], [1], [0, 0, 1, 1], [], []>} : vector<8x16xbf16>, vector<16x64xbf16>, vector<8x64xf32> -> vector<8x64xf32>
    %8 = vector.extract_strided_slice %1 {offsets = [0, 0], sizes = [1, 64], strides = [1, 1]} : vector<8x64xf32> to vector<1x64xf32>
    %9 = vector.broadcast %8 : vector<1x64xf32> to vector<8x64xf32>
    %10 = arith.addf %7, %9 : vector<8x64xf32>
    %cst_5 = arith.constant 0.000000e+00 : f32
    %11 = vector.broadcast %cst_5 : f32 to vector<8x64xf32>
    %12 = arith.maximumf %10, %11 : vector<8x64xf32>
    %c0_6 = arith.constant 0 : index
    %c0_7 = arith.constant 0 : index
    %13 = vector.load %arg3[%c0_6, %c0_7] : memref<200x64xbf16, #tpu.memory_space<vmem>>, vector<64x64xbf16>
    %14 = arith.truncf %12 : vector<8x64xf32> to vector<8x64xbf16>
    %cst_8 = arith.constant dense<0.000000e+00> : vector<8x64xf32>
    %15 = tpu.matmul %14, %13, %cst_8 {dimension_numbers = #tpu.dot_dimension_numbers<[1], [0], [0], [1], [0, 0, 1, 1], [], []>} : vector<8x64xbf16>, vector<64x64xbf16>, vector<8x64xf32> -> vector<8x64xf32>
    %16 = vector.extract_strided_slice %1 {offsets = [1, 0], sizes = [1, 64], strides = [1, 1]} : vector<8x64xf32> to vector<1x64xf32>
    %17 = vector.broadcast %16 : vector<1x64xf32> to vector<8x64xf32>
    %18 = arith.addf %15, %17 : vector<8x64xf32>
    %cst_9 = arith.constant 0.000000e+00 : f32
    %19 = vector.broadcast %cst_9 : f32 to vector<8x64xf32>
    %20 = arith.maximumf %18, %19 : vector<8x64xf32>
    %c64_10 = arith.constant 64 : index
    %c0_11 = arith.constant 0 : index
    %21 = vector.load %arg3[%c64_10, %c0_11] : memref<200x64xbf16, #tpu.memory_space<vmem>>, vector<64x64xbf16>
    %22 = arith.truncf %20 : vector<8x64xf32> to vector<8x64xbf16>
    %cst_12 = arith.constant dense<0.000000e+00> : vector<8x64xf32>
    %23 = tpu.matmul %22, %21, %cst_12 {dimension_numbers = #tpu.dot_dimension_numbers<[1], [0], [0], [1], [0, 0, 1, 1], [], []>} : vector<8x64xbf16>, vector<64x64xbf16>, vector<8x64xf32> -> vector<8x64xf32>
    %24 = vector.extract_strided_slice %1 {offsets = [2, 0], sizes = [1, 64], strides = [1, 1]} : vector<8x64xf32> to vector<1x64xf32>
    %25 = vector.broadcast %24 : vector<1x64xf32> to vector<8x64xf32>
    %26 = arith.addf %23, %25 : vector<8x64xf32>
    %cst_13 = arith.constant 0.000000e+00 : f32
    %27 = vector.broadcast %cst_13 : f32 to vector<8x64xf32>
    %28 = arith.maximumf %26, %27 : vector<8x64xf32>
    %c128 = arith.constant 128 : index
    %c0_14 = arith.constant 0 : index
    %29 = vector.load %arg3[%c128, %c0_14] : memref<200x64xbf16, #tpu.memory_space<vmem>>, vector<64x64xbf16>
    %30 = arith.truncf %28 : vector<8x64xf32> to vector<8x64xbf16>
    %cst_15 = arith.constant dense<0.000000e+00> : vector<8x64xf32>
    %31 = tpu.matmul %30, %29, %cst_15 {dimension_numbers = #tpu.dot_dimension_numbers<[1], [0], [0], [1], [0, 0, 1, 1], [], []>} : vector<8x64xbf16>, vector<64x64xbf16>, vector<8x64xf32> -> vector<8x64xf32>
    %32 = vector.extract_strided_slice %1 {offsets = [3, 0], sizes = [1, 64], strides = [1, 1]} : vector<8x64xf32> to vector<1x64xf32>
    %33 = vector.broadcast %32 : vector<1x64xf32> to vector<8x64xf32>
    %34 = arith.addf %31, %33 : vector<8x64xf32>
    %cst_16 = arith.constant 0.000000e+00 : f32
    %35 = vector.broadcast %cst_16 : f32 to vector<8x64xf32>
    %36 = arith.maximumf %34, %35 : vector<8x64xf32>
    %37 = arith.truncf %36 : vector<8x64xf32> to vector<8x64xbf16>
    %c0_17 = arith.constant 0 : index
    %c0_18 = arith.constant 0 : index
    %38 = vector.load %arg4[%c0_17, %c0_18] : memref<72x128xbf16, #tpu.memory_space<vmem>>, vector<64x128xbf16>
    %cst_19 = arith.constant dense<0.000000e+00> : vector<8x128xf32>
    %39 = tpu.matmul %37, %38, %cst_19 {dimension_numbers = #tpu.dot_dimension_numbers<[1], [0], [0], [1], [0, 0, 1, 1], [], []>} : vector<8x64xbf16>, vector<64x128xbf16>, vector<8x128xf32> -> vector<8x128xf32>
    %40 = vector.extract_strided_slice %3 {offsets = [0, 0], sizes = [1, 128], strides = [1, 1]} : vector<8x128xf32> to vector<1x128xf32>
    %41 = vector.broadcast %40 : vector<1x128xf32> to vector<8x128xf32>
    %42 = arith.addf %39, %41 : vector<8x128xf32>
    %43 = vector.extract_strided_slice %3 {offsets = [1, 0], sizes = [1, 128], strides = [1, 1]} : vector<8x128xf32> to vector<1x128xf32>
    %44 = vector.broadcast %43 : vector<1x128xf32> to vector<8x128xf32>
    %45 = arith.maximumf %42, %44 : vector<8x128xf32>
    %46 = vector.extract_strided_slice %3 {offsets = [2, 0], sizes = [1, 128], strides = [1, 1]} : vector<8x128xf32> to vector<1x128xf32>
    %47 = vector.broadcast %46 : vector<1x128xf32> to vector<8x128xf32>
    %48 = arith.minimumf %45, %47 : vector<8x128xf32>
    %49 = vector.extract_strided_slice %48 {offsets = [0, 0], sizes = [8, 16], strides = [1, 1]} : vector<8x128xf32> to vector<8x16xf32>
    %c0_20 = arith.constant 0 : index
    %c0_21 = arith.constant 0 : index
    %50 = vector.load %arg5[%c0_20, %c0_21] : memref<8x16xf32, #tpu.memory_space<vmem>>, vector<8x16xf32>
    tpu.vector_store %arg5[%c0_20, %c0_21], %49 {strides = array<i32>} : memref<8x16xf32, #tpu.memory_space<vmem>>, vector<8x16xf32>,
    return
  }
  func.func @transform_0(%arg0: i32) -> (i32, i32) {
    %c0_i32 = arith.constant 0 : i32
    %c0_i32_0 = arith.constant 0 : i32
    return %arg0, %c0_i32 : i32, i32
  }
  func.func @transform_1(%arg0: i32) -> (i32, i32) {
    %c0_i32 = arith.constant 0 : i32
    %c0_i32_0 = arith.constant 0 : i32
    %c0_i32_1 = arith.constant 0 : i32
    return %c0_i32, %c0_i32_0 : i32, i32
  }
  func.func @transform_2(%arg0: i32) -> (i32, i32) {
    %c0_i32 = arith.constant 0 : i32
    %c0_i32_0 = arith.constant 0 : i32
    %c0_i32_1 = arith.constant 0 : i32
    return %c0_i32, %c0_i32_0 : i32, i32
  }
  func.func @transform_3(%arg0: i32) -> (i32, i32) {
    %c0_i32 = arith.constant 0 : i32
    %c0_i32_0 = arith.constant 0 : i32
    %c0_i32_1 = arith.constant 0 : i32
    return %c0_i32, %c0_i32_0 : i32, i32
  }
  func.func @transform_4(%arg0: i32) -> (i32, i32) {
    %c0_i32 = arith.constant 0 : i32
    %c0_i32_0 = arith.constant 0 : i32
    return %arg0, %c0_i32 : i32, i32
  }
}

</mosaic_0001>

<bundles_post_ra>
// kernel: actor_forward.1
= control target key start
LH: loop header
LB: loop body
LE: loop exit
PB: predicated region body
PF: predicated region fallthrough
CT: control target
= control target key end

     0   :  { %v537_v0 = vmov 0.0   ;;  %vm538_vm0 = vmmov 0   ;;  %vm36_vm1 = vcmask 130048   ;;  %v26_v10 = vlaneseq  ;;  %s676_s1 = inlined_call_operand.vmem [shape: bf16[16,64], index: 1, kind: input, shape index: {}]   ;;  %s677_s0 = inlined_call_operand.vmem [shape: f32[8,16], index: 0, kind: input, shape index: {}]   ;;  %s678_s2 = inlined_call_operand.vmem [shape: bf16[200,64], index: 2, kind: input, shape index: {}]   ;;  %s679_s3 = inlined_call_operand.vmem [shape: bf16[72,128], index: 3, kind: input, shape index: {}]   ;;  %s680_s4 = inlined_call_operand.vmem [shape: f32[8,16], index: 4, kind: output, shape index: {}]  }
   0x1   :  { %464 = vmatprep.subr.bf16.mxu0 %v537_v0  ;;  %v520_v1 = vld [vmem:[%s676_s1] sm:$0xff]   ;;  %466 = vmatprep.mubr.msk.bf16.mxu0 %vm538_vm0, %v537_v0  ;;  %v521_v4 = vld [vmem:[%s678_s2 + $0x18] sm:$0xff]   ;;  %v522_v5 = vld [vmem:[%s678_s2 + $0x10] sm:$0xff]   ;;  %vm118_vm2 = vcmask 523264  }
   0x2   :  { %v22_v2 = vld [vmem:[%s677_s0] sm:$0xff]  ;;  %470 = vmatprep.subr.bf16.mxu1 %v537_v0  ;;  %478 = vmatprep.mubr.msk.bf16.mxu1 %vm538_vm0, %v537_v0  ;;  %v523_v6 = vld [vmem:[%s678_s2 + $0x8] sm:$0xff]   ;;  %v525_v8 = vld [vmem:[%s678_s2 + $0x38] sm:$0xff]   ;;  %v604_v11 = vshrl.u32 %v26_v10, 7 }
   0x3   :  { %465 = vmatpush3.bf16.msra.mxu0 %v520_v1  ;;  %v23_v3 = vpack.c.bf16 %v22_v2, %v22_v2  ;;  %471 = vmatpush3.bf16.msra.mxu1 %v521_v4  ;;  %v524_v7 = vld [vmem:[%s678_s2] sm:$0xff]   ;;  %v526_v9 = vld [vmem:[%s678_s2 + $0x30] sm:$0xff]   ;;  %v527_v23 = vld [vmem:[%s678_s2 + $0x28] sm:$0xff]  }
   0x4   :  { %482 = vmatprep.subr.bf16.mxu0 %v537_v0  ;;  %472 = vmatprep.subr.bf16.mxu1 %v537_v0  ;;  %v18_v12 = vld [vmem:[%s678_s2 + $0x60] sm:$0xf]  ;;  %v28_v14 = vsub.s32 0, %v604_v11  ;;  %v529_v25 = vld [vmem:[%s678_s2 + $0x58] sm:$0xff]   ;;  %v530_v26 = vld [vmem:[%s678_s2 + $0x50] sm:$0xff]   ;;  %v92_v27 = vsub.s32 1, %v604_v11 }
   0x5   :  { %v609_v13 = vunpack.c.l.bf16 %v18_v12  ;;  %v528_v24 = vld [vmem:[%s678_s2 + $0x20] sm:$0xff]   ;;  %v531_v36 = vld [vmem:[%s678_s2 + $0x48] sm:$0xff]   ;;  %v533_v38 = vld [vmem:[%s679_s3 + $0x18] sm:$0xff]   ;;  %v174_v40 = vsub.s32 2, %v604_v11  ;;  %v255_v51 = vsub.s32 3, %v604_v11 }
   0x6   :  { %467 = vmatmul.mubr.msk.bf16.vlgmr.msra.gmra.mxu0 %vm36_vm1, %v23_v3  ;;  %v532_v37 = vld [vmem:[%s678_s2 + $0x40] sm:$0xff]   ;;  %v534_v39 = vld [vmem:[%s679_s3 + $0x10] sm:$0xff]   ;;  %v535_v49 = vld [vmem:[%s679_s3 + $0x8] sm:$0xff]  }
   0x7   :  { %490 = vmatprep.mubr.msk.bf16.mxu0 %vm538_vm0, %v537_v0  ;;  %473 = vmatpush3.bf16.msra.mxu1 %v522_v5  ;;  %v29_v15 = vrot.slane %v609_v13, %v28_v14  ;;  %v93_v28 = vrot.slane %v609_v13, %v92_v27  ;;  %v175_v41 = vrot.slane %v609_v13, %v174_v40  ;;  %v536_v50 = vld [vmem:[%s679_s3] sm:$0xff]  }
   0x8   :  { %474 = vmatprep.subr.bf16.mxu1 %v537_v0  ;;  %483 = vmatpush3.bf16.msra.mxu0 %v525_v8  ;;  %v256_v52 = vrot.slane %v609_v13, %v255_v51  ;;  %v20_v60 = vld [vmem:[%s679_s3 + $0x20] sm:$0xf] }
   0x9   :  { %484 = vmatprep.subr.bf16.mxu0 %v537_v0  ;;  %v21_v61 = vunpack.c.l.bf16 %v20_v60 }
   0xb   :  { %475 = vmatpush3.bf16.msra.mxu1 %v523_v6  ;;  %v337_v62 = vrot.slane %v21_v61, %v28_v14  ;;  %v408_v63 = vrot.slane %v21_v61, %v92_v27  ;;  %v413_v2 = vrot.slane %v21_v61, %v174_v40 }
   0xc   :  { %476 = vmatprep.subr.bf16.mxu1 %v537_v0  ;;  %485 = vmatpush3.bf16.msra.mxu0 %v526_v9 }
   0xd   :  { %486 = vmatprep.subr.bf16.mxu0 %v537_v0 }
   0xf   :  { %477 = vmatpush3.bf16.msra.mxu1 %v524_v7 }
  0x10   :  { %494 = vmatprep.subr.bf16.mxu1 %v537_v0  ;;  %487 = vmatpush3.bf16.msra.mxu0 %v527_v23 }
  0x11   :  { %488 = vmatprep.subr.bf16.mxu0 %v537_v0 }
  0x14   :  { %489 = vmatpush3.bf16.msra.mxu0 %v528_v24 }
  0x15   :  { %506 = vmatprep.subr.bf16.mxu0 %v537_v0 }
  0xc6   :  { %v74_v16 = vpop.f32.mrf.mxu0 }
  0xc7   :  { %v75_v17 = vadd.f32 %v74_v16, %v29_v15 }
  0xc8   :  { %v468_v18 = vpop.f32.mrf.mxu0 }
  0xc9   :  { %v80_v19 = vmax.f32 %v75_v17, 0.0 }
  0xca   :  { %v77_v20 = vpop.f32.mrf.mxu0 }
  0xcb   :  { %v89_v21 = vpack.c.bf16 %v80_v19, %v80_v19 }
  0xcc   :  { %v469_v22 = vpop.f32.mrf.mxu0 }
  0xcd   :  { %479 = vmatmul.mubr.msk.bf16.vlgmr.msra.gmra.mxu1 %vm118_vm2, %v89_v21 }
  0xce   :  { %502 = vmatprep.mubr.msk.bf16.mxu1 %vm538_vm0, %v537_v0  ;;  %495 = vmatpush3.bf16.msra.mxu1 %v529_v25 }
  0xcf   :  { %496 = vmatprep.subr.bf16.mxu1 %v537_v0 }
  0xd2   :  { %497 = vmatpush3.bf16.msra.mxu1 %v530_v26 }
  0xd3   :  { %498 = vmatprep.subr.bf16.mxu1 %v537_v0 }
  0xd6   :  { %499 = vmatpush3.bf16.msra.mxu1 %v531_v36 }
  0xd7   :  { %500 = vmatprep.subr.bf16.mxu1 %v537_v0 }
  0xda   :  { %501 = vmatpush3.bf16.msra.mxu1 %v532_v37 }
 0x18d   :  { %v156_v29 = vpop.f32.mrf.mxu1 }
 0x18e   :  { %v157_v30 = vadd.f32 %v156_v29, %v93_v28 }
 0x18f   :  { %v480_v31 = vpop.f32.mrf.mxu1 }
 0x190   :  { %v162_v32 = vmax.f32 %v157_v30, 0.0 }
 0x191   :  { %v159_v33 = vpop.f32.mrf.mxu1 }
 0x192   :  { %v171_v34 = vpack.c.bf16 %v162_v32, %v162_v32 }
 0x193   :  { %v481_v35 = vpop.f32.mrf.mxu1 }
 0x194   :  { %491 = vmatmul.mubr.msk.bf16.vlgmr.msra.gmra.mxu0 %vm118_vm2, %v171_v34 }
 0x195   :  { %514 = vmatprep.mubr.msk.bf16.mxu0 %vm538_vm0, %v537_v0  ;;  %507 = vmatpush3.bf16.msra.mxu0 %v533_v38 }
 0x196   :  { %508 = vmatprep.subr.bf16.mxu0 %v537_v0 }
 0x199   :  { %509 = vmatpush3.bf16.msra.mxu0 %v534_v39 }
 0x19a   :  { %510 = vmatprep.subr.bf16.mxu0 %v537_v0 }
 0x19d   :  { %511 = vmatpush3.bf16.msra.mxu0 %v535_v49 }
 0x19e   :  { %512 = vmatprep.subr.bf16.mxu0 %v537_v0 }
 0x1a1   :  { %513 = vmatpush3.bf16.msra.mxu0 %v536_v50 }
 0x254   :  { %v237_v42 = vpop.f32.mrf.mxu0 }
 0x255   :  { %v238_v43 = vadd.f32 %v237_v42, %v175_v41 }
 0x256   :  { %v492_v44 = vpop.f32.mrf.mxu0 }
 0x257   :  { %v243_v45 = vmax.f32 %v238_v43, 0.0 }
 0x258   :  { %v240_v46 = vpop.f32.mrf.mxu0 }
 0x259   :  { %v252_v47 = vpack.c.bf16 %v243_v45, %v243_v45 }
 0x25a   :  { %v493_v48 = vpop.f32.mrf.mxu0 }
 0x25b   :  { %503 = vmatmul.mubr.msk.bf16.vlgmr.msra.gmra.mxu1 %vm118_vm2, %v252_v47 }
 0x31b   :  { %v318_v53 = vpop.f32.mrf.mxu1 }
 0x31c   :  { %v319_v54 = vadd.f32 %v318_v53, %v256_v52 }
 0x31d   :  { %v504_v55 = vpop.f32.mrf.mxu1 }
 0x31e   :  { %v324_v56 = vmax.f32 %v319_v54, 0.0 }
 0x31f   :  { %v321_v57 = vpop.f32.mrf.mxu1 }
 0x320   :  { %v325_v58 = vpack.c.bf16 %v324_v56, %v324_v56 }
 0x321   :  { %v505_v59 = vpop.f32.mrf.mxu1 }
 0x322   :  { %515 = vmatmul.mubr.msk.bf16.vlgmr.msra.gmra.mxu0 %vm118_vm2, %v325_v58 }
 0x3e2   :  { %v399_v0 = vpop.f32.mrf.mxu0 }
 0x3e3   :  { %v400_v1 = vadd.f32 %v399_v0, %v337_v62 }
 0x3e4   :  { %v516_v3 = vpop.f32.mrf.mxu0 }
 0x3e5   :  { %v409_v4 = vmax.f32 %v400_v1, %v408_v63 }
 0x3e6   :  { %v402_v5 = vpop.f32.mrf.mxu0 }
 0x3e7   :  { %v414_v6 = vmin.f32 %v409_v4, %v413_v2 }
 0x3e8   :  { %v517_v7 = vpop.f32.mrf.mxu0 }
 0x3e9   :  { %415 = vst.msk [vmem:[%s680_s4] sm:$0xff] %vm36_vm1, %v414_v6 }

</bundles_post_ra>
